<compile_context>
chip_gen: v7x
topology: tpu7x:2x2x1
jax: 0.10.0
libtpu: 0.0.40
codegen_flags: <defaults>
</compile_context>

<pallas_src>
import numpy as np
import jax
import jax.numpy as jnp
from jax import lax
from jax.experimental import pallas as pl
from jax.experimental.pallas import tpu as pltpu


# ----------------------------------------------------------------------------
# Fused kernel, per (batch n, output-pixel tile p):
#   logits      = W_kc @ X_c_hw + b                (MXU, f32 accumulation, bias once)
#   out[n,:,p*] = logits @ R^T[:, p-tile]          (MXU, batched over all classes)
# ----------------------------------------------------------------------------
def _fused_seg_kernel(x_ref, w_ref, b_ref, rt_ref, o_ref):
    # 1x1 conv on the MXU: (K, C) @ (C, H*W) -> (K, H*W).
    logits = jnp.dot(w_ref[...], x_ref[...], preferred_element_type=jnp.float32)
    logits = logits + b_ref[...]                       # single (K, 1) broadcast add

    # Bilinear resize for all K classes at once: (K, H*W) @ (H*W, P_tile).
    out = jnp.dot(logits.astype(rt_ref.dtype), rt_ref[...],
                  preferred_element_type=jnp.float32)

    # Single lane-dense store of the whole (K, P_tile) block (P_tile % 128 == 0).
    o_ref[...] = out.astype(o_ref.dtype)


# ----------------------------------------------------------------------------
# Interpolation matrices (PyTorch F.interpolate bilinear, align_corners=False)
# ----------------------------------------------------------------------------
def bilinear_matrix_np(out_size, in_size):
    i = np.arange(out_size, dtype=np.float64)
    src = (i + 0.5) * (in_size / out_size) - 0.5
    src = np.maximum(src, 0.0)                      # PyTorch clamps source index to >= 0
    i0 = np.minimum(np.floor(src).astype(np.int64), in_size - 1)
    i1 = np.minimum(i0 + 1, in_size - 1)
    lam = src - i0
    m = np.zeros((out_size, in_size), dtype=np.float32)
    m[np.arange(out_size), i0] += (1.0 - lam).astype(np.float32)
    m[np.arange(out_size), i1] += lam.astype(np.float32)
    return m


def segmentation_wrapper_forward(x, w, b, ori_size, *, use_bf16_matmul=False, p_tile=512):
    """x: (N, C, H, W), w: (C, K), b: (1, K) -> (N, K, ori_size[0], ori_size[1])."""
    N, C, H, W = x.shape
    K = w.shape[1]
    H_out, W_out = ori_size
    HW = H * W
    P = H_out * W_out                               # flattened output pixels (lane axis)
    if P % p_tile != 0:
        p_tile = P                                  # fall back to a single pixel tile

    # Separable bilinear operators folded into one (H*W, H_out*W_out) matrix.
    ry_np = bilinear_matrix_np(H_out, H)            # (H_out, H)
    rx_np = bilinear_matrix_np(W_out, W)            # (W_out, W)
    rt_np = np.kron(ry_np, rx_np).T.astype(np.float32)   # (H*W, H_out*W_out)

    op_dtype = jnp.bfloat16 if use_bf16_matmul else jnp.float32
    x2d = x.reshape(N, C, HW).astype(op_dtype)      # wrapper-side reshape is free
    w_t = jnp.transpose(w).astype(op_dtype)         # (K, C), tiny
    b_k = b.reshape(K, 1).astype(jnp.float32)       # (K, 1)
    rt = jnp.asarray(rt_np, dtype=op_dtype)         # (HW, P)

    out_flat = pl.pallas_call(
        _fused_seg_kernel,
        out_shape=jax.ShapeDtypeStruct((N, K, P), jnp.float32),
        grid=(N, P // p_tile),
        in_specs=[
            pl.BlockSpec((None, C, HW), lambda n, p: (n, 0, 0)),   # x: constant over p
            pl.BlockSpec((K, C),        lambda n, p: (0, 0)),      # conv weight (VMEM)
            pl.BlockSpec((K, 1),        lambda n, p: (0, 0)),      # conv bias   (VMEM)
            pl.BlockSpec((HW, p_tile),  lambda n, p: (0, p)),      # resize operator tile
        ],
        out_specs=pl.BlockSpec((None, K, p_tile), lambda n, p: (n, 0, p)),
        compiler_params=pltpu.CompilerParams(
            dimension_semantics=("parallel", "parallel"),   # batch x pixel-tiles (megacore)
            vmem_limit_bytes=48 * 1024 * 1024),
    )(x2d, w_t, b_k, rt)

    return out_flat.reshape(N, K, H_out, W_out)


# ----------------------------------------------------------------------------
# Pure-JAX reference (same math) for a correctness sanity check
# ----------------------------------------------------------------------------
def reference_forward(x, w, b, ori_size):
    N, C, H, W = x.shape
    H_out, W_out = ori_size
    logits = jnp.einsum('nchw,ck->nkhw', x, w,
                        precision=lax.Precision.HIGHEST) + b.reshape(1, -1, 1, 1)
    ry = jnp.asarray(bilinear_matrix_np(H_out, H))
    rx = jnp.asarray(bilinear_matrix_np(W_out, W))
    return jnp.einsum('oh,nkhw,vw->nkov', ry, logits, rx,
                      precision=lax.Precision.HIGHEST)


if __name__ == "__main__":
    N, C, H, W = 2, 4, 16, 16
    NUM_CLASSES = 8
    ORI_SIZE = (32, 32)

    key = jax.random.PRNGKey(0)
    kx, kw, kb = jax.random.split(key, 3)
    x = jax.random.normal(kx, (N, C, H, W), dtype=jnp.float32)
    w = jax.random.normal(kw, (C, NUM_CLASSES), dtype=jnp.float32) * 0.1
    b = jax.random.normal(kb, (1, NUM_CLASSES), dtype=jnp.float32) * 0.01

    out = segmentation_wrapper_forward(x, w, b, ORI_SIZE)
    out = jax.block_until_ready(out)

    assert out.shape == (N, NUM_CLASSES, ORI_SIZE[0], ORI_SIZE[1]), out.shape
    ref = jax.block_until_ready(reference_forward(x, w, b, ORI_SIZE))
    assert jnp.allclose(out, ref, atol=1e-4, rtol=1e-4), "mismatch vs reference"

    print("KERNEL_OK")
</pallas_src>

<mosaic_0001>
module attributes {stable_mosaic.version = 11 : i64} {
  func.func @_fused_seg_kernel(%arg0: i32, %arg1: i32, %arg2: memref<1x4x256xf32, #tpu.memory_space<vmem>>, %arg3: memref<8x4xf32, #tpu.memory_space<vmem>>, %arg4: memref<8x1xf32, #tpu.memory_space<vmem>>, %arg5: memref<256x512xf32, #tpu.memory_space<vmem>>, %arg6: memref<1x8x512xf32, #tpu.memory_space<vmem>>) attributes {dimension_semantics = [#tpu.dimension_semantics<parallel>, #tpu.dimension_semantics<parallel>], iteration_bounds = array<i64: 2, 2>, scalar_prefetch = 0 : i64, scratch_operands = 0 : i64, tpu.core_type = #tpu.core_type<tc>, window_params = [{transform_indices = @transform_0, window_bounds = array<i64: 1, 4, 256>}, {pipeline_mode = #tpu.pipeline_mode<synchronous>, transform_indices = @transform_1, window_bounds = array<i64: 8, 4>}, {pipeline_mode = #tpu.pipeline_mode<synchronous>, transform_indices = @transform_2, window_bounds = array<i64: 8, 1>}, {transform_indices = @transform_3, window_bounds = array<i64: 256, 512>}, {transform_indices = @transform_4, window_bounds = array<i64: 1, 8, 512>}]} {
    %c0 = arith.constant 0 : index
    %c0_0 = arith.constant 0 : index
    %0 = vector.load %arg3[%c0, %c0_0] : memref<8x4xf32, #tpu.memory_space<vmem>>, vector<8x4xf32>
    %c0_1 = arith.constant 0 : index
    %c0_2 = arith.constant 0 : index
    %c0_3 = arith.constant 0 : index
    %1 = vector.load %arg2[%c0_1, %c0_2, %c0_3] : memref<1x4x256xf32, #tpu.memory_space<vmem>>, vector<1x4x256xf32>
    %2 = vector.shape_cast %1 : vector<1x4x256xf32> to vector<4x256xf32>
    %cst = arith.constant dense<0.000000e+00> : vector<8x256xf32>
    %3 = tpu.matmul %0, %2, %cst {dimension_numbers = #tpu.dot_dimension_numbers<[1], [0], [0], [1], [0, 0, 1, 1], [], []>} : vector<8x4xf32>, vector<4x256xf32>, vector<8x256xf32> -> vector<8x256xf32>
    %c0_4 = arith.constant 0 : index
    %c0_5 = arith.constant 0 : index
    %4 = vector.load %arg4[%c0_4, %c0_5] : memref<8x1xf32, #tpu.memory_space<vmem>>, vector<8x1xf32>
    %5 = vector.broadcast %4 : vector<8x1xf32> to vector<8x256xf32>
    %6 = arith.addf %3, %5 : vector<8x256xf32>
    %c0_6 = arith.constant 0 : index
    %c0_7 = arith.constant 0 : index
    %7 = vector.load %arg5[%c0_6, %c0_7] : memref<256x512xf32, #tpu.memory_space<vmem>>, vector<256x512xf32>
    %cst_8 = arith.constant dense<0.000000e+00> : vector<8x512xf32>
    %8 = tpu.matmul %6, %7, %cst_8 {dimension_numbers = #tpu.dot_dimension_numbers<[1], [0], [0], [1], [0, 0, 1, 1], [], []>} : vector<8x256xf32>, vector<256x512xf32>, vector<8x512xf32> -> vector<8x512xf32>
    %c0_9 = arith.constant 0 : index
    %c0_10 = arith.constant 0 : index
    %c0_11 = arith.constant 0 : index
    %9 = vector.load %arg6[%c0_9, %c0_10, %c0_11] : memref<1x8x512xf32, #tpu.memory_space<vmem>>, vector<1x8x512xf32>
    %10 = vector.shape_cast %9 : vector<1x8x512xf32> to vector<8x512xf32>
    %11 = vector.shape_cast %8 : vector<8x512xf32> to vector<1x8x512xf32>
    tpu.vector_store %arg6[%c0_9, %c0_10, %c0_11], %11 {strides = array<i32>} : memref<1x8x512xf32, #tpu.memory_space<vmem>>, vector<1x8x512xf32>,
    return
  }
  func.func @transform_0(%arg0: i32, %arg1: i32) -> (i32, i32, i32) {
    %c0_i32 = arith.constant 0 : i32
    %c0_i32_0 = arith.constant 0 : i32
    %c0_i32_1 = arith.constant 0 : i32
    return %arg0, %c0_i32, %c0_i32_0 : i32, i32, i32
  }
  func.func @transform_1(%arg0: i32, %arg1: i32) -> (i32, i32) {
    %c0_i32 = arith.constant 0 : i32
    %c0_i32_0 = arith.constant 0 : i32
    %c0_i32_1 = arith.constant 0 : i32
    return %c0_i32, %c0_i32_0 : i32, i32
  }
  func.func @transform_2(%arg0: i32, %arg1: i32) -> (i32, i32) {
    %c0_i32 = arith.constant 0 : i32
    %c0_i32_0 = arith.constant 0 : i32
    %c0_i32_1 = arith.constant 0 : i32
    return %c0_i32, %c0_i32_0 : i32, i32
  }
  func.func @transform_3(%arg0: i32, %arg1: i32) -> (i32, i32) {
    %c0_i32 = arith.constant 0 : i32
    %c0_i32_0 = arith.constant 0 : i32
    return %c0_i32, %arg1 : i32, i32
  }
  func.func @transform_4(%arg0: i32, %arg1: i32) -> (i32, i32, i32) {
    %c0_i32 = arith.constant 0 : i32
    %c0_i32_0 = arith.constant 0 : i32
    return %arg0, %c0_i32, %arg1 : i32, i32, i32
  }
}

</mosaic_0001>

<bundles_post_ra>
// kernel: tpu_custom_call.1
= control target key start
LH: loop header
LB: loop body
LE: loop exit
PB: predicated region body
PF: predicated region fallthrough
CT: control target
= control target key end

     0   :  { %9 = vsyncpa [#allocation3], 0  ;;  %s1536_s0 = inlined_call_operand.vmem [shape: f32[2,4,256], index: 0, kind: input, shape index: {}]   ;;  %s1537_s1 = inlined_call_operand.vmem [shape: f32[8,4], index: 1, kind: input, shape index: {}]   ;;  %s1538_s2 = inlined_call_operand.vmem [shape: f32[8,1], index: 2, kind: input, shape index: {}]   ;;  %s1539_s3 = inlined_call_operand.hbm [shape: f32[256,1024], index: 3, kind: input, shape index: {}]   ;;  %s1540_s4 = inlined_call_operand.hbm [shape: f32[2,8,1024], index: 4, kind: output, shape index: {}]  }
   0x1   :  { %11 = vsyncpa [#allocation3 + $0x1], 0 }
   0x2   :  { %12 = vsyncpa [#allocation4], 0 }
   0x3   :  { %14 = vsyncpa [#allocation4 + $0x1], 0  ;;  %s1175_s15 = smov 0   ;;  %s1177_s16 = smov 0  }
   0x4   :  { %s1179_s17 = smov 0   ;;  %s1181_s18 = smov 0  }
   0x5   :  { %s1183_s19 = smov 0   ;;  %s1185_s20 = smov 0  }
   0x6   :  { %s1187_s21 = smov 0   ;;  %s1189_s22 = smov 0  }
   0x7   :  { %s1191_s23 = smov 0   ;;  %s1193_s24 = smov 0  }
   0x8   :  { %s1195_s25 = smov 0  }
   0x9 LB: > { %s729_s26 = sadd.s32 4294967295, %s1141_s25   ;;  %s730_s27 = sadd.s32 4294967294, %s1141_s25   ;;  %s1141_s25 = sphi %s1195_s25, %s20_s25   ;;  %s1137_s24 = sphi %s1193_s24, %s1564_s24   ;;  %s1133_s23 = sphi %s1191_s23, %s1563_s23   ;;  %s1129_s22 = sphi %s1189_s22, %s1562_s22   ;;  %s1125_s21 = sphi %s1187_s21, %s1561_s21   ;;  %s1121_s20 = sphi %s1185_s20, %s1560_s20   ;;  %s1117_s19 = sphi %s1183_s19, %s1559_s19   ;;  %s1113_s18 = sphi %s1181_s18, %s1558_s18   ;;  %s1109_s17 = sphi %s1179_s17, %s1557_s17   ;;  %s1105_s16 = sphi %s1177_s16, %s1556_s16   ;;  %s1101_s15 = sphi %s1175_s15, %s1555_s15  }
   0xa   : > { %s29_s28 = sadd.s32 1, %s1133_s23  ;;  %s32_s29 = sadd.s32 1, %s1137_s24 }
   0xb   : > { %p30_p0 = scmp.ge.s32.totalorder %s29_s28, 2  ;;  %s107_s30 = sadd.s32 1, %s1121_s20 }
   0xc   : > { %p114_p1 = scmp.ne.s32.totalorder %s1121_s20, %s1117_s19  ;;  %p115_p2 = scmp.eq.s32.totalorder %s1141_s25, 0 }
   0xd   : > { %s1566_s28 = smov (%p30_p0, %s29_s28), 0  ;;  %s1568_s29 = smov (!%p30_p0, %s32_s29), %s1137_s24 }
   0xe   : > { %1544 = sst [smem:[#allocation8_spill]] %s1566_s28  ;;  %s104_s5 = ssub.s32 %s1133_s23, %s1566_s28 }
   0xf   : > { %p1241_p3 = por %p115_p2, %p114_p1  ;;  %p34_p4 = scmp.ge.s32.totalorder %s1568_s29, 2 }
  0x10   : > { %p105_p5 = scmp.eq.s32.totalorder %s104_s5, 0  ;;  %p120_p6 = scmp.ne.s32.totalorder %s1117_s19, %s1113_s18 }
  0x11   : > { %p121_p7 = scmp.eq.s32.totalorder %s729_s26, 0  ;;  %s1570_s29 = smov (%p34_p4, %s1568_s29), 0 }
  0x12   : > { %1546 = sst [smem:[#allocation9_spill]] %s1570_s29  ;;  %s130_s9 = ssub.s32 %s1137_s24, %s1570_s29 }
  0x13   : > { %s1249_s7 = scalar_select %p105_p5, %s1121_s20, %s107_s30  }
  0x14   : > { %p1251_p8 = por %p121_p7, %p120_p6  ;;  %s132_s10 = sor.u32 %s130_s9, %s104_s5 }
  0x15   : > { %s135_s11 = sadd.s32 1, %s1109_s17  ;;  %p133_p9 = scmp.eq.s32.totalorder %s132_s10, 0 }
  0x16   : > { %p145_p10 = scmp.ne.s32.totalorder %s1109_s17, %s1105_s16  ;;  %p146_p11 = scmp.eq.s32.totalorder %s729_s26, 3 }
  0x17   : > { %p151_p12 = scmp.ne.s32.totalorder %s1105_s16, %s1101_s15  ;;  %p152_p0 = scmp.eq.s32.totalorder %s730_s27, 3 }
  0x18   : > { %s1263_s12 = scalar_select %p133_p9, %s1109_s17, %s135_s11  }
  0x19   : > { %p1265_p13 = por %p146_p11, %p145_p10  ;;  %p892_p1 = scmp.lt.s32.totalorder %s1141_s25, 4 }
  0x1a   : > { %p1270_p2 = por %p152_p0, %p151_p12  ;;  %s186_s18 = sand.u32 1, %s1121_s20  }
  0x1b   : > { %s1548_s13 = scalar_select %p1265_p13, 1, 0 }
  0x1c   : > { %s1549_s14 = scalar_select %p1270_p2, 1, 0 }
  0x1d   : > { %s733_s30 = sshll.u32 %s186_s18, 10  ;;  %s750_s5 = sshll.u32 %s1133_s23, 9 }
  0x1e   : > { %s1279_s26 = scalar_lea.hbm %s1539_s3, %s750_s5  ;;  %s190_s11 = scalar_lea.vmem [#allocation2], %s733_s30 }
  0x1f   : > { %s197_s29 = sshll.u32 %s190_s11, 4  ;;  %p1285_p4 = pnand %p892_p1, %p1241_p3  ;;  %s1281_s29 = int_to_ptr.vmem [resolvable:$true] %s197_s29 }
  0x20   : > { %s1289_s28 = scalar_lea.sflag [#allocation3], %s186_s18  ;;  %s989_s9 = scalar_lea.hbm %s1279_s26, 16384 }
  0x21   : > { %p990_p5 = scmp.ne.s32.totalorder %s1279_s26, %s989_s9  ;;  %p991_p6 = pneg %p1285_p4 }
  0x22   : > { %s994_s6 = scalar_lea.hbm %s1539_s3, 32768  ;;  %p995_p3 = scmp.lt.u32.totalorder %s1279_s26, %s1539_s3 }
  0x23   : > { %p992_p7 = pnand %p991_p6, %p990_p5  ;;  %p996_p10 = scmp.lt.u32.totalorder %s994_s6, %s989_s9 }
  0x24   : > { %p998_p12 = scmp.lt.u32.totalorder %s989_s9, %s1279_s26 }
  0x25   : > { %p993_p9 = pneg %p992_p7  ;;  %p997_p11 = por %p996_p10, %p995_p3 }
  0x27   : > { %p999_p0 = por %p998_p12, %p997_p11 }
  0x29   : > { %p1000_p1 = pnand %p999_p0, %p993_p9 }
  0x2b   : > { %1003 = shalt.err (!%p1000_p1)
}
  0x2c   : > { %s1004_s18 = scalar_lea.vmem %s1281_s29, 16384  ;;  %s1143_s30 = smov [#allocation2]  }
  0x2d   : > { %p1005_p5 = scmp.ne.s32.totalorder %s1281_s29, %s1004_s18  ;;  %s1009_s5 = sshll.u32 %s1143_s30, 4  ;;  %s1010_s5 = int_to_ptr.vmem [resolvable:$false] %s1009_s5 }
  0x2e   : > { %s1011_s10 = scalar_lea.vmem %s1010_s5, 32768  ;;  %p1012_p13 = scmp.lt.s32.totalorder %s1281_s29, %s1010_s5 }
  0x2f   : > { %p1007_p7 = pnand %p1005_p5, %p991_p6  ;;  %p1013_p3 = scmp.lt.s32.totalorder %s1011_s10, %s1004_s18 }
  0x31   : > { %p1008_p2 = pneg %p1007_p7  ;;  %p1014_p10 = por %p1013_p3, %p1012_p13 }
  0x33   : > { %p1015_p11 = pnand %p1014_p10, %p1008_p2 }
  0x35   : > { %1018 = shalt.err (!%p1015_p11)
}
  0x36   : > { %s1144_s9 = smov 1024   ;;  %s1145_s6 = smov 512  }
  0x37   : > { %s1146_s11 = smov 32   ;;  %p736_p6 = scmp.ge.s32.totalorder %s1141_s25, 1 }
  0x38   : > { %887 = dma.hbm_to_vmem [thread:$0]  (!%p1285_p4), %s1279_s26, 16384, %s1281_s29, %s1289_s28, %s1144_s9, %s1145_s6, %s1146_s11  }
  0x39   : > { %p205_p9 = scmp.lt.s32.totalorder %s1141_s25, 5 }
  0x3b   : > { %p206_p12 = pnand %p736_p6, %p205_p9 }
  0x3c   : > { %s211_s18 = sand.u32 (!%p206_p12), 1, %s1117_s19  }
  0x3d   : > { %209 = sbr.rel (%p206_p12) target bundleno = 523 (0x20b), region = 36  ;;  %s737_s30 = sshll.u32 (!%p206_p12), %s211_s18, 10 }
  0x3e   : > { %s212_s5 = scalar_lea.sflag (!%p206_p12), [#allocation3], %s211_s18  ;;  %s1320_s10 = scalar_lea.vmem (!%p206_p12), [#allocation2], %s737_s30 }
  0x44   : > { %1092 = dma.done.wait (%p1251_p8), %s212_s5, 16384  }
  0x45   : > { %1094 = vsyncadd (%p1251_p8), %s212_s5, 4294950912  ;;  %p245_p13 = scmp.lt.s32.totalorder %s1129_s22, 1  ;;  %v1147_v0 = vmov 0.0   ;;  %v1148_v1 = vmov 0   ;;  %vm266_vm0 = vcmask 1043456   ;;  %v252_v3 = vld [vmem:[%s1537_s1] sm:$0xff] }
  0x46   : > { %335 = vmatprep.mubr.f32.mxu0 %v1147_v0  ;;  %987 = vset.pattern.permute.xlu0 %v1148_v1  ;;  %v254_v4 = vld [vmem:[%s1538_s2] sm:$0xff]  ;;  %v343_v6 = vld [vmem:[%s1320_s10 + $0x8] sm:$0xff]  ;;  %v345_v8 = vld [vmem:[%s1320_s10 + $0x18] sm:$0xff]  ;;  %vm262_vm1 = vcmask 31744   ;;  %s242_s30 = sand.u32 1, %s1105_s16   ;;  %p1551_p2 = scmp.ne.s32.totalorder %s1548_s13, 0 }
  0x47   : > { %s246_s28 = scalar_select %p245_p13, %s1129_s22, 1  ;;  %257 = vperm.xlu0 %987, %v254_v4   ;;  %v347_v7 = vld [vmem:[%s1320_s10 + $0x28] sm:$0xff]  ;;  %v349_v10 = vld [vmem:[%s1320_s10 + $0x38] sm:$0xff]  ;;  %v342_v11 = vld [vmem:[%s1320_s10] sm:$0xff] }
  0x48   : > { %v752_v9 = vpack.c.bf16 %v347_v7, %v343_v6  ;;  %v346_v12 = vld [vmem:[%s1320_s10 + $0x20] sm:$0xff]  ;;  %v816_v13 = vpack.c.bf16 %v349_v10, %v345_v8  ;;  %v344_v15 = vld [vmem:[%s1320_s10 + $0x10] sm:$0xff]  ;;  %v351_v17 = vld [vmem:[%s1320_s10 + $0x48] sm:$0xff]  ;;  %s738_s5 = sshll.u32 %s242_s30, 5  ;;  %s1149_s18 = smov [#allocation5]  }
  0x49   : > { %s751_s29 = sshll.u32 %s246_s28, 3  ;;  %v754_v14 = vpack.c.bf16 %v346_v12, %v342_v11  ;;  %v348_v16 = vld [vmem:[%s1320_s10 + $0x30] sm:$0xff]  ;;  %v355_v19 = vld [vmem:[%s1320_s10 + $0x68] sm:$0xff]  ;;  %v353_v20 = vld [vmem:[%s1320_s10 + $0x58] sm:$0xff]  ;;  %s745_s28 = sshll.u32 %s1125_s21, 2 }
  0x4a   : > { %s249_s8 = scalar_lea.vmem %s1536_s0, %s751_s29  ;;  %753 = vmatprep.subr.bf16.mxu1 %v752_v9  ;;  %v818_v18 = vpack.c.bf16 %v348_v16, %v344_v15  ;;  %v357_v21 = vld [vmem:[%s1320_s10 + $0x78] sm:$0xff]  ;;  %v756_v22 = vpack.c.bf16 %v355_v19, %v351_v17  ;;  %v350_v24 = vld [vmem:[%s1320_s10 + $0x40] sm:$0xff]  ;;  %v352_v26 = vld [vmem:[%s1320_s10 + $0x50] sm:$0xff]  ;;  %s244_s26 = scalar_lea.vmem [#allocation5], %s738_s5 }
  0x4b   : > { %v253_v2 = vld [vmem:[%s249_s8] sm:$0xff]  ;;  %v820_v23 = vpack.c.bf16 %v357_v21, %v353_v20  ;;  %755 = vmatpush1.bf16.msra.mxu1 %v754_v14  ;;  %v356_v28 = vld [vmem:[%s1320_s10 + $0x70] sm:$0xff]  ;;  %v359_v29 = vld [vmem:[%s1320_s10 + $0x88] sm:$0xff]  ;;  %s633_s27 = sshll.u32 %s244_s26, 4  ;;  %s617_s21 = scalar_lea.sflag [#allocation4], %s242_s30  ;;  %s1471_s27 = int_to_ptr.vmem [resolvable:$true] %s633_s27 }
  0x4c   : > { %v261_v5 = vcombine.high %v253_v2, %v253_v2  ;;  %v354_v25 = vld [vmem:[%s1320_s10 + $0x60] sm:$0xff]  ;;  %v363_v30 = vld [vmem:[%s1320_s10 + $0xa8] sm:$0xff]  ;;  %757 = vmatprep.subr.bf16.mxu1 %v756_v22  ;;  %v822_v31 = vpack.c.bf16 %v356_v28, %v352_v26  ;;  %v361_v33 = vld [vmem:[%s1320_s10 + $0x98] sm:$0xff]  ;;  %s1023_s5 = sshll.u32 %s1149_s18, 4  ;;  %s1024_s5 = int_to_ptr.vmem [resolvable:$false] %s1023_s5 }
  0x4d   : > { %v758_v27 = vpack.c.bf16 %v354_v25, %v350_v24  ;;  %v760_v32 = vpack.c.bf16 %v363_v30, %v359_v29  ;;  %v365_v34 = vld [vmem:[%s1320_s10 + $0xb8] sm:$0xff]  ;;  %v358_v35 = vld [vmem:[%s1320_s10 + $0x80] sm:$0xff]  ;;  %v360_v38 = vld [vmem:[%s1320_s10 + $0x90] sm:$0xff]  ;;  %p1026_p1 = scmp.lt.s32.totalorder %s1471_s27, %s1024_s5 }
  0x4e   : > { %741 = vmatprep.subr.msk.mxu0 %vm266_vm0, %v261_v5  ;;  %v824_v36 = vpack.c.bf16 %v365_v34, %v361_v33  ;;  %v362_v37 = vld [vmem:[%s1320_s10 + $0xa0] sm:$0xff]  ;;  %v364_v39 = vld [vmem:[%s1320_s10 + $0xb0] sm:$0xff]  ;;  %v367_v40 = vld [vmem:[%s1320_s10 + $0xc8] sm:$0xff] }
  0x4f   : > { %742 = vmatpush1.msk.msra.mxu0 %vm266_vm0, %v253_v2  ;;  %v371_v41 = vld [vmem:[%s1320_s10 + $0xe8] sm:$0xff]  ;;  %v369_v42 = vld [vmem:[%s1320_s10 + $0xd8] sm:$0xff]  ;;  %759 = vmatpush1.bf16.msra.mxu1 %v758_v27  ;;  %v762_v43 = vpack.c.bf16 %v362_v37, %v358_v35  ;;  %v826_v44 = vpack.c.bf16 %v364_v39, %v360_v38  ;;  %v366_v46 = vld [vmem:[%s1320_s10 + $0xc0] sm:$0xff] }
  0x50   : > { %743 = vmatmul.mubr.msk.f32.vlgmr.msra.gmra.mrb[0].mxu0 %vm262_vm1, %v252_v3  ;;  %817 = vmatprep.subr.bf16.mxu0 %v816_v13  ;;  %v373_v45 = vld [vmem:[%s1320_s10 + $0xf8] sm:$0xff]  ;;  %v370_v47 = vld [vmem:[%s1320_s10 + $0xe0] sm:$0xff]  ;;  %v764_v48 = vpack.c.bf16 %v371_v41, %v367_v40  ;;  %v368_v50 = vld [vmem:[%s1320_s10 + $0xd0] sm:$0xff] }
  0x51   : > { %819 = vmatpush1.bf16.msra.mxu0 %v818_v18  ;;  %761 = vmatprep.subr.bf16.mxu1 %v760_v32  ;;  %v828_v49 = vpack.c.bf16 %v373_v45, %v369_v42  ;;  %v372_v51 = vld [vmem:[%s1320_s10 + $0xf0] sm:$0xff]  ;;  %v375_v52 = vld [vmem:[%s1320_s10 + $0x108] sm:$0xff]  ;;  %v377_v54 = vld [vmem:[%s1320_s10 + $0x118] sm:$0xff]  ;;  %v766_v56 = vpack.c.bf16 %v370_v47, %v366_v46 }
  0x52   : > { %821 = vmatprep.subr.bf16.mxu0 %v820_v23  ;;  %v379_v53 = vld [vmem:[%s1320_s10 + $0x128] sm:$0xff]  ;;  %v381_v55 = vld [vmem:[%s1320_s10 + $0x138] sm:$0xff]  ;;  %v830_v57 = vpack.c.bf16 %v372_v51, %v368_v50  ;;  %v374_v58 = vld [vmem:[%s1320_s10 + $0x100] sm:$0xff] }
  0x53   : > { %763 = vmatpush1.bf16.msra.mxu1 %v762_v43  ;;  %v378_v59 = vld [vmem:[%s1320_s10 + $0x120] sm:$0xff]  ;;  %v768_v60 = vpack.c.bf16 %v379_v53, %v375_v52  ;;  %v832_v61 = vpack.c.bf16 %v381_v55, %v377_v54  ;;  %v376_v62 = vld [vmem:[%s1320_s10 + $0x110] sm:$0xff]  ;;  %v383_v0 = vld [vmem:[%s1320_s10 + $0x148] sm:$0xff] }
  0x54   : > { %765 = vmatprep.subr.bf16.mxu1 %v764_v48  ;;  %v380_v63 = vld [vmem:[%s1320_s10 + $0x130] sm:$0xff]  ;;  %v387_v1 = vld [vmem:[%s1320_s10 + $0x168] sm:$0xff]  ;;  %v385_v2 = vld [vmem:[%s1320_s10 + $0x158] sm:$0xff]  ;;  %v770_v4 = vpack.c.bf16 %v378_v59, %v374_v58 }
  0x55   : > { %823 = vmatpush1.bf16.msra.mxu0 %v822_v31  ;;  %v389_v3 = vld [vmem:[%s1320_s10 + $0x178] sm:$0xff]  ;;  %v834_v5 = vpack.c.bf16 %v380_v63, %v376_v62  ;;  %v382_v6 = vld [vmem:[%s1320_s10 + $0x140] sm:$0xff]  ;;  %v772_v8 = vpack.c.bf16 %v387_v1, %v383_v0  ;;  %v384_v10 = vld [vmem:[%s1320_s10 + $0x150] sm:$0xff] }
  0x56   : > { %825 = vmatprep.subr.bf16.mxu0 %v824_v36  ;;  %v386_v7 = vld [vmem:[%s1320_s10 + $0x160] sm:$0xff]  ;;  %v836_v9 = vpack.c.bf16 %v389_v3, %v385_v2  ;;  %v388_v11 = vld [vmem:[%s1320_s10 + $0x170] sm:$0xff]  ;;  %v391_v12 = vld [vmem:[%s1320_s10 + $0x188] sm:$0xff] }
  0x57   : > { %767 = vmatpush1.bf16.msra.mxu1 %v766_v56  ;;  %v395_v13 = vld [vmem:[%s1320_s10 + $0x1a8] sm:$0xff]  ;;  %v393_v14 = vld [vmem:[%s1320_s10 + $0x198] sm:$0xff]  ;;  %v774_v16 = vpack.c.bf16 %v386_v7, %v382_v6  ;;  %v838_v17 = vpack.c.bf16 %v388_v11, %v384_v10  ;;  %v390_v18 = vld [vmem:[%s1320_s10 + $0x180] sm:$0xff] }
  0x58   : > { %769 = vmatprep.subr.bf16.mxu1 %v768_v60  ;;  %v397_v15 = vld [vmem:[%s1320_s10 + $0x1b8] sm:$0xff]  ;;  %v394_v19 = vld [vmem:[%s1320_s10 + $0x1a0] sm:$0xff]  ;;  %v776_v20 = vpack.c.bf16 %v395_v13, %v391_v12  ;;  %v392_v22 = vld [vmem:[%s1320_s10 + $0x190] sm:$0xff] }
  0x59   : > { %827 = vmatpush1.bf16.msra.mxu0 %v826_v44  ;;  %v840_v21 = vpack.c.bf16 %v397_v15, %v393_v14  ;;  %v396_v23 = vld [vmem:[%s1320_s10 + $0x1b0] sm:$0xff]  ;;  %v399_v24 = vld [vmem:[%s1320_s10 + $0x1c8] sm:$0xff]  ;;  %v401_v26 = vld [vmem:[%s1320_s10 + $0x1d8] sm:$0xff]  ;;  %v778_v28 = vpack.c.bf16 %v394_v19, %v390_v18 }
  0x5a   : > { %829 = vmatprep.subr.bf16.mxu0 %v828_v49  ;;  %v403_v25 = vld [vmem:[%s1320_s10 + $0x1e8] sm:$0xff]  ;;  %v405_v27 = vld [vmem:[%s1320_s10 + $0x1f8] sm:$0xff]  ;;  %v842_v29 = vpack.c.bf16 %v396_v23, %v392_v22  ;;  %v398_v30 = vld [vmem:[%s1320_s10 + $0x1c0] sm:$0xff] }
  0x5b   : > { %771 = vmatpush1.bf16.msra.mxu1 %v770_v4  ;;  %v402_v31 = vld [vmem:[%s1320_s10 + $0x1e0] sm:$0xff]  ;;  %v780_v32 = vpack.c.bf16 %v403_v25, %v399_v24  ;;  %v844_v33 = vpack.c.bf16 %v405_v27, %v401_v26  ;;  %v400_v34 = vld [vmem:[%s1320_s10 + $0x1d0] sm:$0xff]  ;;  %v407_v36 = vld [vmem:[%s1320_s10 + $0x208] sm:$0xff] }
  0x5c   : > { %773 = vmatprep.subr.bf16.mxu1 %v772_v8  ;;  %v404_v35 = vld [vmem:[%s1320_s10 + $0x1f0] sm:$0xff]  ;;  %v411_v37 = vld [vmem:[%s1320_s10 + $0x228] sm:$0xff]  ;;  %v409_v38 = vld [vmem:[%s1320_s10 + $0x218] sm:$0xff]  ;;  %v782_v40 = vpack.c.bf16 %v402_v31, %v398_v30 }
  0x5d   : > { %831 = vmatpush1.bf16.msra.mxu0 %v830_v57  ;;  %v413_v39 = vld [vmem:[%s1320_s10 + $0x238] sm:$0xff]  ;;  %v846_v41 = vpack.c.bf16 %v404_v35, %v400_v34  ;;  %v406_v42 = vld [vmem:[%s1320_s10 + $0x200] sm:$0xff]  ;;  %v784_v44 = vpack.c.bf16 %v411_v37, %v407_v36  ;;  %v408_v46 = vld [vmem:[%s1320_s10 + $0x210] sm:$0xff] }
  0x5e   : > { %833 = vmatprep.subr.bf16.mxu0 %v832_v61  ;;  %v410_v43 = vld [vmem:[%s1320_s10 + $0x220] sm:$0xff]  ;;  %v848_v45 = vpack.c.bf16 %v413_v39, %v409_v38  ;;  %v412_v47 = vld [vmem:[%s1320_s10 + $0x230] sm:$0xff]  ;;  %v415_v48 = vld [vmem:[%s1320_s10 + $0x248] sm:$0xff] }
  0x5f   : > { %775 = vmatpush1.bf16.msra.mxu1 %v774_v16  ;;  %v419_v49 = vld [vmem:[%s1320_s10 + $0x268] sm:$0xff]  ;;  %v417_v50 = vld [vmem:[%s1320_s10 + $0x258] sm:$0xff]  ;;  %v786_v52 = vpack.c.bf16 %v410_v43, %v406_v42  ;;  %v850_v53 = vpack.c.bf16 %v412_v47, %v408_v46  ;;  %v414_v54 = vld [vmem:[%s1320_s10 + $0x240] sm:$0xff] }
  0x60   : > { %777 = vmatprep.subr.bf16.mxu1 %v776_v20  ;;  %v421_v51 = vld [vmem:[%s1320_s10 + $0x278] sm:$0xff]  ;;  %v418_v55 = vld [vmem:[%s1320_s10 + $0x260] sm:$0xff]  ;;  %v788_v56 = vpack.c.bf16 %v419_v49, %v415_v48  ;;  %v416_v58 = vld [vmem:[%s1320_s10 + $0x250] sm:$0xff] }
  0x61   : > { %835 = vmatpush1.bf16.msra.mxu0 %v834_v5  ;;  %v852_v57 = vpack.c.bf16 %v421_v51, %v417_v50  ;;  %v420_v59 = vld [vmem:[%s1320_s10 + $0x270] sm:$0xff]  ;;  %v423_v60 = vld [vmem:[%s1320_s10 + $0x288] sm:$0xff]  ;;  %v425_v62 = vld [vmem:[%s1320_s10 + $0x298] sm:$0xff]  ;;  %v790_v0 = vpack.c.bf16 %v418_v55, %v414_v54 }
  0x62   : > { %837 = vmatprep.subr.bf16.mxu0 %v836_v9  ;;  %v427_v61 = vld [vmem:[%s1320_s10 + $0x2a8] sm:$0xff]  ;;  %v429_v63 = vld [vmem:[%s1320_s10 + $0x2b8] sm:$0xff]  ;;  %v854_v1 = vpack.c.bf16 %v420_v59, %v416_v58  ;;  %v422_v2 = vld [vmem:[%s1320_s10 + $0x280] sm:$0xff] }
  0x63   : > { %779 = vmatpush1.bf16.msra.mxu1 %v778_v28  ;;  %v426_v3 = vld [vmem:[%s1320_s10 + $0x2a0] sm:$0xff]  ;;  %v792_v4 = vpack.c.bf16 %v427_v61, %v423_v60  ;;  %v856_v5 = vpack.c.bf16 %v429_v63, %v425_v62  ;;  %v424_v6 = vld [vmem:[%s1320_s10 + $0x290] sm:$0xff]  ;;  %v431_v8 = vld [vmem:[%s1320_s10 + $0x2c8] sm:$0xff] }
  0x64   : > { %781 = vmatprep.subr.bf16.mxu1 %v780_v32  ;;  %v428_v7 = vld [vmem:[%s1320_s10 + $0x2b0] sm:$0xff]  ;;  %v435_v9 = vld [vmem:[%s1320_s10 + $0x2e8] sm:$0xff]  ;;  %v433_v10 = vld [vmem:[%s1320_s10 + $0x2d8] sm:$0xff]  ;;  %v794_v12 = vpack.c.bf16 %v426_v3, %v422_v2 }
  0x65   : > { %839 = vmatpush1.bf16.msra.mxu0 %v838_v17  ;;  %v437_v11 = vld [vmem:[%s1320_s10 + $0x2f8] sm:$0xff]  ;;  %v858_v13 = vpack.c.bf16 %v428_v7, %v424_v6  ;;  %v430_v14 = vld [vmem:[%s1320_s10 + $0x2c0] sm:$0xff]  ;;  %v796_v16 = vpack.c.bf16 %v435_v9, %v431_v8  ;;  %v432_v18 = vld [vmem:[%s1320_s10 + $0x2d0] sm:$0xff] }
  0x66   : > { %841 = vmatprep.subr.bf16.mxu0 %v840_v21  ;;  %v434_v15 = vld [vmem:[%s1320_s10 + $0x2e0] sm:$0xff]  ;;  %v860_v17 = vpack.c.bf16 %v437_v11, %v433_v10  ;;  %v436_v19 = vld [vmem:[%s1320_s10 + $0x2f0] sm:$0xff]  ;;  %v439_v20 = vld [vmem:[%s1320_s10 + $0x308] sm:$0xff] }
  0x67   : > { %783 = vmatpush1.bf16.msra.mxu1 %v782_v40  ;;  %v443_v21 = vld [vmem:[%s1320_s10 + $0x328] sm:$0xff]  ;;  %v441_v22 = vld [vmem:[%s1320_s10 + $0x318] sm:$0xff]  ;;  %v798_v24 = vpack.c.bf16 %v434_v15, %v430_v14  ;;  %v862_v25 = vpack.c.bf16 %v436_v19, %v432_v18  ;;  %v438_v26 = vld [vmem:[%s1320_s10 + $0x300] sm:$0xff] }
  0x68   : > { %785 = vmatprep.subr.bf16.mxu1 %v784_v44  ;;  %v445_v23 = vld [vmem:[%s1320_s10 + $0x338] sm:$0xff]  ;;  %v442_v27 = vld [vmem:[%s1320_s10 + $0x320] sm:$0xff]  ;;  %v800_v28 = vpack.c.bf16 %v443_v21, %v439_v20  ;;  %v440_v30 = vld [vmem:[%s1320_s10 + $0x310] sm:$0xff] }
  0x69   : > { %843 = vmatpush1.bf16.msra.mxu0 %v842_v29  ;;  %v864_v29 = vpack.c.bf16 %v445_v23, %v441_v22  ;;  %v444_v31 = vld [vmem:[%s1320_s10 + $0x330] sm:$0xff]  ;;  %v447_v32 = vld [vmem:[%s1320_s10 + $0x348] sm:$0xff]  ;;  %v449_v34 = vld [vmem:[%s1320_s10 + $0x358] sm:$0xff]  ;;  %v802_v36 = vpack.c.bf16 %v442_v27, %v438_v26 }
  0x6a   : > { %845 = vmatprep.subr.bf16.mxu0 %v844_v33  ;;  %v451_v33 = vld [vmem:[%s1320_s10 + $0x368] sm:$0xff]  ;;  %v453_v35 = vld [vmem:[%s1320_s10 + $0x378] sm:$0xff]  ;;  %v866_v37 = vpack.c.bf16 %v444_v31, %v440_v30  ;;  %v446_v38 = vld [vmem:[%s1320_s10 + $0x340] sm:$0xff] }
  0x6b   : > { %787 = vmatpush1.bf16.msra.mxu1 %v786_v52  ;;  %v450_v39 = vld [vmem:[%s1320_s10 + $0x360] sm:$0xff]  ;;  %v804_v40 = vpack.c.bf16 %v451_v33, %v447_v32  ;;  %v448_v42 = vld [vmem:[%s1320_s10 + $0x350] sm:$0xff]  ;;  %v455_v44 = vld [vmem:[%s1320_s10 + $0x388] sm:$0xff] }
  0x6c   : > { %789 = vmatprep.subr.bf16.mxu1 %v788_v56  ;;  %v452_v43 = vld [vmem:[%s1320_s10 + $0x370] sm:$0xff]  ;;  %v457_v46 = vld [vmem:[%s1320_s10 + $0x398] sm:$0xff]  ;;  %v806_v48 = vpack.c.bf16 %v450_v39, %v446_v38  ;;  %v454_v50 = vld [vmem:[%s1320_s10 + $0x380] sm:$0xff] }
  0x6d   : > { %847 = vmatpush1.bf16.msra.mxu0 %v846_v41  ;;  %v868_v41 = vpack.c.bf16 %v453_v35, %v449_v34  ;;  %v461_v47 = vld [vmem:[%s1320_s10 + $0x3b8] sm:$0xff]  ;;  %v870_v49 = vpack.c.bf16 %v452_v43, %v448_v42  ;;  %v456_v54 = vld [vmem:[%s1320_s10 + $0x390] sm:$0xff]  ;;  %v463_v58 = vld [vmem:[%s1320_s10 + $0x3c8] sm:$0xff] }
  0x6e   : > { %849 = vmatprep.subr.bf16.mxu0 %v848_v45  ;;  %v459_v45 = vld [vmem:[%s1320_s10 + $0x3a8] sm:$0xff]  ;;  %v872_v52 = vpack.c.bf16 %v461_v47, %v457_v46  ;;  %v460_v55 = vld [vmem:[%s1320_s10 + $0x3b0] sm:$0xff]  ;;  %v465_v60 = vld [vmem:[%s1320_s10 + $0x3d8] sm:$0xff] }
  0x6f   : > { %791 = vmatpush1.bf16.msra.mxu1 %v790_v0  ;;  %v808_v51 = vpack.c.bf16 %v459_v45, %v455_v44  ;;  %v467_v59 = vld [vmem:[%s1320_s10 + $0x3e8] sm:$0xff]  ;;  %v469_v62 = vld [vmem:[%s1320_s10 + $0x3f8] sm:$0xff]  ;;  %v462_v63 = vld [vmem:[%s1320_s10 + $0x3c0] sm:$0xff] }
  0x70   : > { %793 = vmatprep.subr.bf16.mxu1 %v792_v4  ;;  %v812_v61 = vpack.c.bf16 %v467_v59, %v463_v58  ;;  %v466_v0 = vld [vmem:[%s1320_s10 + $0x3e0] sm:$0xff]  ;;  %v464_v3 = vld [vmem:[%s1320_s10 + $0x3d0] sm:$0xff] }
  0x71   : > { %851 = vmatpush1.bf16.msra.mxu0 %v850_v53  ;;  %v458_v53 = vld [vmem:[%s1320_s10 + $0x3a0] sm:$0xff]  ;;  %v814_v2 = vpack.c.bf16 %v466_v0, %v462_v63  ;;  %v468_v4 = vld [vmem:[%s1320_s10 + $0x3f0] sm:$0xff]  ;;  %s746_s10 = sshll.u32 %s1129_s22, 3  ;;  %s1019_s22 = scalar_lea.vmem %s1471_s27, 512 }
  0x72   : > { %853 = vmatprep.subr.bf16.mxu0 %v852_v57  ;;  %v810_v56 = vpack.c.bf16 %v458_v53, %v454_v50  ;;  %v874_v57 = vpack.c.bf16 %v460_v55, %v456_v54  ;;  %s629_s29 = sadd.s32 %s746_s10, %s745_s28  ;;  %p1020_p8 = scmp.ne.s32.totalorder %s1471_s27, %s1019_s22 }
  0x73   : > { %795 = vmatpush1.bf16.msra.mxu1 %v794_v12  ;;  %s747_s8 = sshll.u32 %s629_s29, 7  ;;  %s1025_s28 = scalar_lea.vmem %s1024_s5, 1024 }
  0x74   : > { %797 = vmatprep.subr.bf16.mxu1 %v796_v16  ;;  %s1476_s11 = scalar_lea.hbm %s1540_s4, %s747_s8  ;;  %p1021_p4 = pnand %p1020_p8, %p1551_p2 }
  0x75   : > { %855 = vmatpush1.bf16.msra.mxu0 %v854_v1  ;;  %v876_v1 = vpack.c.bf16 %v469_v62, %v465_v60  ;;  %p1027_p5 = scmp.lt.s32.totalorder %s1025_s28, %s1019_s22 }
  0x76   : > { %857 = vmatprep.subr.bf16.mxu0 %v856_v5  ;;  %v878_v5 = vpack.c.bf16 %v468_v4, %v464_v3  ;;  %p1022_p0 = pneg %p1021_p4 }
  0x77   : > { %799 = vmatpush1.bf16.msra.mxu1 %v798_v24  ;;  %p1028_p7 = por %p1027_p5, %p1026_p1 }
  0x78   : > { %801 = vmatprep.subr.bf16.mxu1 %v800_v28 }
  0x79   : > { %859 = vmatpush1.bf16.msra.mxu0 %v858_v13  ;;  %p1029_p3 = pnand %p1028_p7, %p1022_p0 }
  0x7a   : > { %861 = vmatprep.subr.bf16.mxu0 %v860_v17 }
  0x7b   : > { %803 = vmatpush1.bf16.msra.mxu1 %v802_v36 }
  0x7c   : > { %805 = vmatprep.subr.bf16.mxu1 %v804_v40 }
  0x7d   : > { %863 = vmatpush1.bf16.msra.mxu0 %v862_v25 }
  0x7e   : > { %865 = vmatprep.subr.bf16.mxu0 %v864_v29 }
  0x7f   : > { %807 = vmatpush1.bf16.msra.mxu1 %v806_v48 }
  0x80   : > { %809 = vmatprep.subr.bf16.mxu1 %v808_v51 }
  0x81   : > { %867 = vmatpush1.bf16.msra.mxu0 %v866_v37 }
  0x82   : > { %869 = vmatprep.subr.bf16.mxu0 %v868_v41 }
  0x83   : > { %811 = vmatpush1.bf16.msra.mxu1 %v810_v56 }
  0x84   : > { %813 = vmatprep.subr.bf16.mxu1 %v812_v61 }
  0x85   : > { %871 = vmatpush1.bf16.msra.mxu0 %v870_v49 }
  0x86   : > { %873 = vmatprep.subr.bf16.mxu0 %v872_v52 }
  0x87   : > { %815 = vmatpush1.bf16.msra.mxu1 %v814_v2 }
  0x89   : > { %875 = vmatpush1.bf16.msra.mxu0 %v874_v57 }
  0x8a   : > { %877 = vmatprep.subr.bf16.mxu0 %v876_v1 }
  0x8d   : > { %879 = vmatpush1.bf16.msra.mxu0 %v878_v5 }
  0xc6   : > { %v258_v6 = vpop.permute.xlu0 %257 }
 0x123   : > { %v337_v7 = vpop.f32.mrb[0].mxu0 }
 0x124   : > { %v339_v8 = vpop.f32.mrb[1].mxu0  ;;  %v338_v10 = vadd.f32 %v337_v7, %v258_v6 }
 0x125   : > { %v340_v9 = vadd.f32 %v339_v8, %v258_v6 }
 0x127   : > { %534 = vmatprep.mubr.f32.mxu1 %v340_v9  ;;  %605 = vmatprep.mubr.f32.mxu0 %v340_v9 }
 0x128   : > { %535 = vmatmul.mubr.f32.vlgmr.msra.gmra.mrb[0].mxu1 %v338_v10  ;;  %606 = vmatmul.mubr.f32.vlgmr.msra.gmra.mrb[2].mxu0 %v338_v10 }
 0x1fb   : > { %v536_v11 = vpop.f32.mrb[0].mxu1  ;;  %v607_v12 = vpop.f32.mrb[2].mxu0 }
 0x1fc   : > { %612 = vst [vmem:[%s244_s26] sm:$0xff] %v536_v11  ;;  %614 = vst [vmem:[%s244_s26 + $0x10] sm:$0xff] %v607_v12  ;;  %v538_v13 = vpop.f32.mrb[1].mxu1  ;;  %v609_v14 = vpop.f32.mrb[3].mxu0 }
 0x1fd   : > { %613 = vst [vmem:[%s244_s26 + $0x8] sm:$0xff] %v538_v13  ;;  %615 = vst [vmem:[%s244_s26 + $0x18] sm:$0xff] %v609_v14 }
 0x1fe   : > { %1032 = shalt.err (!%p1029_p3)
}
 0x1ff   : > { %s1033_s30 = scalar_lea.hbm %s1476_s11, 512  ;;  %s1037_s26 = scalar_lea.hbm %s1540_s4, 2048 }
 0x200   : > { %p1034_p10 = scmp.ne.s32.totalorder %s1476_s11, %s1033_s30  ;;  %p1038_p9 = scmp.lt.u32.totalorder %s1476_s11, %s1540_s4 }
 0x201   : > { %p1039_p12 = scmp.lt.u32.totalorder %s1037_s26, %s1033_s30  ;;  %p1041_p8 = scmp.lt.u32.totalorder %s1033_s30, %s1476_s11 }
 0x202   : > { %p1035_p11 = pnand %p1034_p10, %p1551_p2 }
 0x203   : > { %p1040_p13 = por %p1039_p12, %p1038_p9 }
 0x204   : > { %p1036_p6 = pneg %p1035_p11 }
 0x205   : > { %p1042_p4 = por %p1041_p8, %p1040_p13 }
 0x207   : > { %p1043_p0 = pnand %p1042_p4, %p1036_p6 }
 0x209   : > { %1046 = shalt.err (!%p1043_p0)
}
 0x20a   : > { %882 = dma.vmem_to_hbm [thread:$0]  (%p1551_p2), %s1471_s27, 512, %s1476_s11, %s617_s21  }
 0x20b PF: > { %p893_p1 = scmp.ge.s32.totalorder %s1141_s25, 2  ;;  %s645_s6 = sand.u32 1, %s1101_s15  }
 0x20c   : > { %p1552_p5 = scmp.ne.s32.totalorder %s1549_s14, 0  ;;  %s646_s22 = scalar_lea.sflag [#allocation4], %s645_s6 }
 0x20e   : > { %p889_p7 = pnand %p893_p1, %p1552_p5 }
 0x210   : > { %1096 = dma.done.wait (!%p889_p7), %s646_s22, 512  }
 0x211   : > { %1098 = vsyncadd (!%p889_p7), %s646_s22, 4294966784  ;;  %s20_s25 = sadd.s32 1, %s1141_s25   ;;  %s1553_s13 = sld [smem:[#allocation8_spill]] }
 0x212   : > { %p17_p3 = scmp.ge.s32.totalorder %s20_s25, 6   ;;  %s1554_s27 = sld [smem:[#allocation9_spill]] }
 0x213   : > { %s1555_s15 = smov %s1105_s16  ;;  %s1556_s16 = smov %s1109_s17 }
 0x214   : > { %s1557_s17 = smov %s1263_s12  ;;  %s1558_s18 = smov %s1117_s19 }
 0x215   : > { %s1559_s19 = smov %s1121_s20  ;;  %s1560_s20 = smov %s1249_s7 }
 0x216   : > { %s1561_s21 = smov %s1133_s23  ;;  %s1562_s22 = smov %s1137_s24 }
 0x217   : > { %s1563_s23 = smov %s1553_s13  ;;  %19 = sbr.rel (!%p17_p3) target bundleno = 9 (0x9), region = 84 }
 0x218   : > { %s1564_s24 = smov %s1554_s27 }
 0x21e   :  { %651 = vsyncpa [#allocation3], 1 }
 0x21f   :  { %653 = vsyncpa [#allocation3 + $0x1], 1 }
 0x220   :  { %654 = vsyncpa [#allocation4], 1 }
 0x221   :  { %656 = vsyncpa [#allocation4 + $0x1], 1 }

</bundles_post_ra>
